<compile_context>
chip_gen: v7x
topology: tpu7x:2x2x1
jax: 0.10.0
libtpu: 0.0.40
codegen_flags: <defaults>
</compile_context>

<pallas_src>
import functools
import math

import numpy as np
import jax
import jax.numpy as jnp
from jax.experimental import pallas as pl
from jax.experimental.pallas import tpu as pltpu

LANE = 128
_MXU_STATS_MAX_WIDTH = 512   # rows narrower than this: MXU row-sums beat XLU reduces
_MAX_FOLD = 64               # lane-density fold cap (hoisted masks stay small)
_MAX_FOLD_WIDTH = 4096       # cap on fold*C so mask matmuls stay under the HBM roofline


def _cdiv(a, b):
    return -(-a // b)


def _round_up(x, m):
    return _cdiv(x, m) * m


def _sublane(dtype):
    # f32 -> 8, bf16 -> 16, int8/fp8 -> 32 row granularity.
    return max(8, 32 // jnp.dtype(dtype).itemsize)


def _default_sizes():
    """Generation-aware (block_bytes, vmem_limit_bytes)."""
    vmem_cap = 128 * 1024 * 1024
    try:
        info = pltpu.get_tpu_info()
        vmem_cap = int(getattr(info, "vmem_capacity_bytes", vmem_cap))
    except Exception:
        pass
    if vmem_cap <= 64 * 1024 * 1024:
        # v7x-class: 64 MiB physical VMEM, ~3.2 TB/s HBM.
        return 4 * 1024 * 1024, 48 * 1024 * 1024
    # v5e / v6e: 128 MiB physical VMEM.
    return 6 * 1024 * 1024, 64 * 1024 * 1024


def _resolve_sizes(block_bytes, vmem_limit_bytes):
    dflt_block, dflt_limit = _default_sizes()
    return (block_bytes or dflt_block), (vmem_limit_bytes or dflt_limit)


def _choose_row_tile(n_rows, row_bytes, block_bytes, sub):
    """Row tile: multiple of `sub` sublanes, ~block_bytes of input, >=2 grid steps."""
    tn = max(sub, (block_bytes // max(row_bytes, 1)) // sub * sub)
    if _cdiv(n_rows, tn) < 2 and n_rows > sub:
        tn = max(sub, _round_up(_cdiv(n_rows, 2), sub))
    return tn


# ---------------------------------------------------------------------------
# channels_last kernels: normalize each row over its trailing C (or fold*C) lanes
# ---------------------------------------------------------------------------
def _ln_last_vpu_kernel(x_ref, w_ref, b_ref, o_ref, *, eps):
    # Wide rows: lane reductions (partial VPU sums + one XLU reduce per row block).
    x = x_ref[...].astype(jnp.float32)                      # (tn, C)
    mean = jnp.mean(x, axis=-1, keepdims=True)
    xc = x - mean
    var = jnp.mean(xc * xc, axis=-1, keepdims=True)         # biased variance
    inv = jax.lax.rsqrt(var + eps)
    o_ref[...] = (xc * inv * w_ref[...].astype(jnp.float32)
                  + b_ref[...].astype(jnp.float32)).astype(o_ref.dtype)


def _ln_last_mxu_kernel(x_ref, w_ref, b_ref, rm_ref, o_ref, *, eps, inv_c):
    # Narrow rows (fold == 1): row sums via the idle MXU (ones matrix), lane 0 holds
    # the result; keeps the 2 XLUs free for a purely memory-bound kernel.
    x = x_ref[...].astype(jnp.float32)                      # (tn, C)
    rm = rm_ref[...]                                        # (C, LANE) all-ones
    mean = (jnp.dot(x, rm, preferred_element_type=jnp.float32) * inv_c)[:, :1]
    xc = x - mean
    var = (jnp.dot(xc * xc, rm, preferred_element_type=jnp.float32) * inv_c)[:, :1]
    inv = jax.lax.rsqrt(var + eps)
    o_ref[...] = (xc * inv * w_ref[...].astype(jnp.float32)
                  + b_ref[...].astype(jnp.float32)).astype(o_ref.dtype)


def _ln_last_fold_kernel(x_ref, w_ref, b_ref, rm_ref, bm_ref, o_ref, *, eps, inv_c):
    # Lane-dense path for small C: each kernel row packs `fold` independent groups;
    # segment stats via precomputed 0/1 masks (resident VMEM inputs) on the MXU.
    x = x_ref[...].astype(jnp.float32)                      # (tn, fold*C)
    rm = rm_ref[...]                                        # (fold*C, fold) 0/1
    bm = bm_ref[...]                                        # (fold, fold*C) 0/1
    seg_mean = jnp.dot(x, rm, preferred_element_type=jnp.float32) * inv_c
    mean = jnp.dot(seg_mean, bm, preferred_element_type=jnp.float32)
    xc = x - mean
    seg_var = jnp.dot(xc * xc, rm, preferred_element_type=jnp.float32) * inv_c
    inv = jnp.dot(jax.lax.rsqrt(seg_var + eps), bm, preferred_element_type=jnp.float32)
    o_ref[...] = (xc * inv * w_ref[...].astype(jnp.float32)
                  + b_ref[...].astype(jnp.float32)).astype(o_ref.dtype)


def layer_norm_channels_last(x, weight, bias, eps=1e-6, block_bytes=None,
                             vmem_limit_bytes=None,
                             mxu_stats_max_width=_MXU_STATS_MAX_WIDTH):
    """x: (..., C); weight/bias: (C,). Normalizes over the last axis."""
    block_bytes, vmem_limit = _resolve_sizes(block_bytes, vmem_limit_bytes)
    orig_shape = x.shape
    C = int(orig_shape[-1])
    n_rows = int(math.prod(orig_shape[:-1])) if len(orig_shape) > 1 else 1
    x2 = x.reshape(n_rows, C)

    # Lane-density fold: reinterpret `fold` consecutive rows as one lane-dense row
    # (metadata-only reshape; no HBM traffic).  Only when n_rows divides evenly —
    # otherwise fall back to the unfolded kernel rather than paying a pad+slice pass.
    fold = 1
    if C % LANE != 0:
        f = LANE // math.gcd(C, LANE)
        if f <= _MAX_FOLD and f * C <= _MAX_FOLD_WIDTH and n_rows % f == 0:
            fold = f
    width = fold * C
    fold_rows = n_rows // fold
    xf = x2.reshape(fold_rows, width)

    sub = _sublane(x.dtype)
    tn = _choose_row_tile(fold_rows, width * x.dtype.itemsize, block_bytes, sub)
    grid = (pl.cdiv(fold_rows, tn),)

    w_row = weight.reshape(1, C)
    b_row = bias.reshape(1, C)
    if fold > 1:
        w_row = jnp.tile(w_row, (1, fold))
        b_row = jnp.tile(b_row, (1, fold))

    x_spec = pl.BlockSpec((tn, width), lambda i: (i, 0))
    p_spec = pl.BlockSpec((1, width), lambda i: (0, 0))
    out_spec = pl.BlockSpec((tn, width), lambda i: (i, 0))

    if fold > 1:
        # Hoisted 0/1 segment masks (depend only on fold and C); resident in VMEM.
        seg = np.arange(width) // C
        reduce_m = jnp.asarray(seg[:, None] == np.arange(fold)[None, :],
                               dtype=jnp.float32)                       # (width, fold)
        bcast_m = jnp.asarray(np.arange(fold)[:, None] == seg[None, :],
                              dtype=jnp.float32)                        # (fold, width)
        kernel = functools.partial(_ln_last_fold_kernel, eps=eps, inv_c=1.0 / C)
        in_specs = [x_spec, p_spec, p_spec,
                    pl.BlockSpec((width, fold), lambda i: (0, 0)),
                    pl.BlockSpec((fold, width), lambda i: (0, 0))]
        operands = (xf, w_row, b_row, reduce_m, bcast_m)
    elif width <= mxu_stats_max_width:
        ones_m = jnp.ones((width, LANE), dtype=jnp.float32)             # resident
        kernel = functools.partial(_ln_last_mxu_kernel, eps=eps, inv_c=1.0 / C)
        in_specs = [x_spec, p_spec, p_spec,
                    pl.BlockSpec((width, LANE), lambda i: (0, 0))]
        operands = (xf, w_row, b_row, ones_m)
    else:
        kernel = functools.partial(_ln_last_vpu_kernel, eps=eps)
        in_specs = [x_spec, p_spec, p_spec]
        operands = (xf, w_row, b_row)

    out = pl.pallas_call(
        kernel,
        out_shape=jax.ShapeDtypeStruct((fold_rows, width), x.dtype),
        grid_spec=pltpu.PrefetchScalarGridSpec(
            num_scalar_prefetch=0,
            grid=grid,
            in_specs=in_specs,
            out_specs=out_spec,
        ),
        compiler_params=pltpu.CompilerParams(
            dimension_semantics=("parallel",),
            vmem_limit_bytes=vmem_limit,
        ),
    )(*operands)
    return out.reshape(orig_shape)


# ---------------------------------------------------------------------------
# channels_first: normalize over the channel dim of (B, C, H, W)
# ---------------------------------------------------------------------------
def _ln_first_kernel(x_ref, w_ref, b_ref, o_ref, *, eps):
    x = x_ref[0].astype(jnp.float32)                        # (C, TS)
    mean = jnp.mean(x, axis=0, keepdims=True)               # (1, TS)
    xc = x - mean
    var = jnp.mean(xc * xc, axis=0, keepdims=True)          # biased variance
    inv = jax.lax.rsqrt(var + eps)
    o_ref[0] = (xc * inv * w_ref[...].astype(jnp.float32)
                + b_ref[...].astype(jnp.float32)).astype(o_ref.dtype)


def layer_norm_channels_first(x, weight, bias, eps=1e-6, block_bytes=None,
                              vmem_limit_bytes=None):
    """x: (B, C, H, W); weight/bias: (C,). Normalizes over the channel axis."""
    block_bytes, vmem_limit = _resolve_sizes(block_bytes, vmem_limit_bytes)
    B, C, H, W = (int(d) for d in x.shape)
    S = H * W
    x3 = x.reshape(B, C, S)
    itemsize = x.dtype.itemsize

    # Spatial tile: 128-lane multiple, ~block_bytes of input, capped at the full extent.
    ts = max(LANE, (block_bytes // max(C * itemsize, 1)) // LANE * LANE)
    ts = min(ts, S) if S >= LANE else S
    s_tiles = pl.cdiv(S, ts)
    # Guarantee >= 2 grid steps on the flattened parallel axis (v7x megacore balance).
    if B * s_tiles < 2 and S > LANE:
        ts = max(LANE, _round_up(_cdiv(S, 2), LANE))
        s_tiles = pl.cdiv(S, ts)

    w2 = weight.reshape(C, 1)
    b2 = bias.reshape(C, 1)

    grid = (B * s_tiles,)   # flattened (batch, spatial-tile) axis -> balanced sharding
    out = pl.pallas_call(
        functools.partial(_ln_first_kernel, eps=eps),
        out_shape=jax.ShapeDtypeStruct((B, C, S), x.dtype),
        grid_spec=pltpu.PrefetchScalarGridSpec(
            num_scalar_prefetch=0,
            grid=grid,
            in_specs=[
                pl.BlockSpec((1, C, ts), lambda i: (i // s_tiles, 0, i % s_tiles)),
                pl.BlockSpec((C, 1), lambda i: (0, 0)),
                pl.BlockSpec((C, 1), lambda i: (0, 0)),
            ],
            out_specs=pl.BlockSpec((1, C, ts), lambda i: (i // s_tiles, 0, i % s_tiles)),
        ),
        compiler_params=pltpu.CompilerParams(
            dimension_semantics=("parallel",),
            vmem_limit_bytes=vmem_limit,
        ),
    )(x3, w2, b2)
    return out.reshape(B, C, H, W)


# ---------------------------------------------------------------------------
# Module-like wrapper with deterministic parameter init (ones / zeros)
# ---------------------------------------------------------------------------
class LayerNorm:
    """Matches the PyTorch reference: eps default 1e-6, channels_last / channels_first."""

    def __init__(self, normalized_shape, eps=1e-6, data_format="channels_last"):
        if data_format not in ("channels_last", "channels_first"):
            raise NotImplementedError
        self.weight = jnp.ones((normalized_shape,), dtype=jnp.float32)
        self.bias = jnp.zeros((normalized_shape,), dtype=jnp.float32)
        self.eps = eps
        self.data_format = data_format

    def __call__(self, x, block_bytes=None):
        if self.data_format == "channels_last":
            return layer_norm_channels_last(x, self.weight, self.bias,
                                            self.eps, block_bytes)
        return layer_norm_channels_first(x, self.weight, self.bias,
                                         self.eps, block_bytes)


# ---------------------------------------------------------------------------
# Pure-JAX references
# ---------------------------------------------------------------------------
def _ref_channels_last(x, w, b, eps):
    x32 = x.astype(jnp.float32)
    u = jnp.mean(x32, axis=-1, keepdims=True)
    s = jnp.mean((x32 - u) ** 2, axis=-1, keepdims=True)
    return ((x32 - u) / jnp.sqrt(s + eps) * w + b).astype(x.dtype)


def _ref_channels_first(x, w, b, eps):
    x32 = x.astype(jnp.float32)
    u = jnp.mean(x32, axis=1, keepdims=True)
    s = jnp.mean((x32 - u) ** 2, axis=1, keepdims=True)
    y = (x32 - u) / jnp.sqrt(s + eps)
    return (w[None, :, None, None] * y + b[None, :, None, None]).astype(x.dtype)


def _check(name, y, ref, tol):
    err = float(jnp.max(jnp.abs(jnp.asarray(y, jnp.float32) - jnp.asarray(ref, jnp.float32))))
    assert err <= tol, f"{name}: max abs err {err} > {tol}"


if __name__ == "__main__":
    key = jax.random.PRNGKey(0)
    ks = jax.random.split(key, 12)

    def make_ln(C, fmt, kw, kb):
        ln = LayerNorm(C, eps=1e-6, data_format=fmt)
        ln.weight = 1.0 + 0.1 * jax.random.normal(kw, (C,), dtype=jnp.float32)
        ln.bias = 0.05 * jax.random.normal(kb, (C,), dtype=jnp.float32)
        return ln

    # Small block_bytes values below only force multi-step grids / boundary-masked
    # blocks at toy shapes; production calls use the generation-aware defaults.

    # 1) channels_last, C=128 (MXU row-stats path), 126 rows -> masked final block.
    C = 128
    x = jax.random.normal(ks[0], (2, 7, 9, C), dtype=jnp.float32)
    ln = make_ln(C, "channels_last", ks[1], ks[2])
    y = jax.block_until_ready(ln(x))
    _check("last_c128", y, _ref_channels_last(x, ln.weight, ln.bias, ln.eps), 2e-3)

    # 2) channels_last, C=32, n_rows=128 divisible by fold=4 -> lane-dense fold path.
    C = 32
    x = jax.random.normal(ks[3], (2, 8, 8, C), dtype=jnp.float32)
    ln = make_ln(C, "channels_last", ks[4], ks[5])
    y = jax.block_until_ready(ln(x, block_bytes=8 * 1024))
    _check("last_c32_fold", y, _ref_channels_last(x, ln.weight, ln.bias, ln.eps), 2e-3)

    # 3) channels_last, C=32, n_rows=126 NOT divisible by fold -> unfolded fallback
    #    (no pad/slice), boundary-masked rows.
    x = jax.random.normal(ks[6], (2, 9, 7, C), dtype=jnp.float32)
    y = jax.block_until_ready(ln(x, block_bytes=8 * 1024))
    _check("last_c32_nofold", y, _ref_channels_last(x, ln.weight, ln.bias, ln.eps), 2e-3)

    # 4) channels_last, C=256, force the wide-row VPU/XLU kernel.
    C = 256
    x = jax.random.normal(ks[7], (2, 4, 8, C), dtype=jnp.float32)
    ln = make_ln(C, "channels_last", ks[8], ks[9])
    y = layer_norm_channels_last(x, ln.weight, ln.bias, ln.eps,
                                 block_bytes=16 * 1024, mxu_stats_max_width=0)
    jax.block_until_ready(y)
    _check("last_c256_vpu", y, _ref_channels_last(x, ln.weight, ln.bias, ln.eps), 1e-4)

    # 5) channels_last, bf16 I/O, C=128.
    C = 128
    x = jax.random.normal(ks[10], (2, 8, 8, C), dtype=jnp.bfloat16)
    ln = make_ln(C, "channels_last", ks[11], ks[0])
    y = jax.block_until_ready(ln(x))
    _check("last_c128_bf16", y, _ref_channels_last(x, ln.weight, ln.bias, ln.eps), 8e-2)

    # 6) channels_first, C=4, spatial tiling TS=128 -> flattened grid of 4 steps.
    C = 4
    x = jax.random.normal(ks[1], (2, C, 16, 16), dtype=jnp.float32)
    ln = make_ln(C, "channels_first", ks[2], ks[3])
    y = jax.block_until_ready(ln(x, block_bytes=2048))
    _check("first_c4", y, _ref_channels_first(x, ln.weight, ln.bias, ln.eps), 1e-4)

    # 7) channels_first, C=32, S=400 -> boundary-masked spatial tiles, grid of 8 steps.
    C = 32
    x = jax.random.normal(ks[4], (2, C, 20, 20), dtype=jnp.float32)
    ln = make_ln(C, "channels_first", ks[5], ks[6])
    y = jax.block_until_ready(ln(x, block_bytes=16 * 1024))
    _check("first_c32", y, _ref_channels_first(x, ln.weight, ln.bias, ln.eps), 1e-4)

    # 8) channels_first, B=1 single-tile input -> forced split into >=2 grid steps.
    C = 8
    x = jax.random.normal(ks[7], (1, C, 16, 16), dtype=jnp.float32)
    ln = make_ln(C, "channels_first", ks[8], ks[9])
    y = jax.block_until_ready(ln(x))
    _check("first_b1_split", y, _ref_channels_first(x, ln.weight, ln.bias, ln.eps), 1e-4)

    print("KERNEL_OK")
</pallas_src>

<mosaic_0001>
module attributes {stable_mosaic.version = 11 : i64} {
  func.func @_ln_last_mxu_kernel(%arg0: i32, %arg1: memref<64x128xf32, #tpu.memory_space<vmem>>, %arg2: memref<1x128xf32, #tpu.memory_space<vmem>>, %arg3: memref<1x128xf32, #tpu.memory_space<vmem>>, %arg4: memref<128x128xf32, #tpu.memory_space<vmem>>, %arg5: memref<64x128xf32, #tpu.memory_space<vmem>>) attributes {dimension_semantics = [#tpu.dimension_semantics<parallel>], iteration_bounds = array<i64: 2>, scalar_prefetch = 0 : i64, scratch_operands = 0 : i64, tpu.core_type = #tpu.core_type<tc>, window_params = [{transform_indices = @transform_0, window_bounds = array<i64: 64, 128>}, {pipeline_mode = #tpu.pipeline_mode<synchronous>, transform_indices = @transform_1, window_bounds = array<i64: 1, 128>}, {pipeline_mode = #tpu.pipeline_mode<synchronous>, transform_indices = @transform_2, window_bounds = array<i64: 1, 128>}, {pipeline_mode = #tpu.pipeline_mode<synchronous>, transform_indices = @transform_3, window_bounds = array<i64: 128, 128>}, {transform_indices = @transform_4, window_bounds = array<i64: 64, 128>}]} {
    %c0 = arith.constant 0 : index
    %c0_0 = arith.constant 0 : index
    %0 = vector.load %arg1[%c0, %c0_0] : memref<64x128xf32, #tpu.memory_space<vmem>>, vector<64x128xf32>
    %c0_1 = arith.constant 0 : index
    %c0_2 = arith.constant 0 : index
    %1 = vector.load %arg4[%c0_1, %c0_2] : memref<128x128xf32, #tpu.memory_space<vmem>>, vector<128x128xf32>
    %cst = arith.constant dense<0.000000e+00> : vector<64x128xf32>
    %2 = tpu.matmul %0, %1, %cst {dimension_numbers = #tpu.dot_dimension_numbers<[1], [0], [0], [1], [0, 0, 1, 1], [], []>} : vector<64x128xf32>, vector<128x128xf32>, vector<64x128xf32> -> vector<64x128xf32>
    %cst_3 = arith.constant 7.812500e-03 : f32
    %3 = vector.broadcast %cst_3 : f32 to vector<64x128xf32>
    %4 = arith.mulf %2, %3 : vector<64x128xf32>
    %5 = vector.extract_strided_slice %4 {offsets = [0, 0], sizes = [64, 1], strides = [1, 1]} : vector<64x128xf32> to vector<64x1xf32>
    %6 = vector.broadcast %5 : vector<64x1xf32> to vector<64x128xf32>
    %7 = arith.subf %0, %6 : vector<64x128xf32>
    %8 = arith.mulf %7, %7 : vector<64x128xf32>
    %cst_4 = arith.constant dense<0.000000e+00> : vector<64x128xf32>
    %9 = tpu.matmul %8, %1, %cst_4 {dimension_numbers = #tpu.dot_dimension_numbers<[1], [0], [0], [1], [0, 0, 1, 1], [], []>} : vector<64x128xf32>, vector<128x128xf32>, vector<64x128xf32> -> vector<64x128xf32>
    %cst_5 = arith.constant 7.812500e-03 : f32
    %10 = vector.broadcast %cst_5 : f32 to vector<64x128xf32>
    %11 = arith.mulf %9, %10 : vector<64x128xf32>
    %12 = vector.extract_strided_slice %11 {offsets = [0, 0], sizes = [64, 1], strides = [1, 1]} : vector<64x128xf32> to vector<64x1xf32>
    %cst_6 = arith.constant 9.99999997E-7 : f32
    %13 = vector.broadcast %cst_6 : f32 to vector<64x1xf32>
    %14 = arith.addf %12, %13 : vector<64x1xf32>
    %15 = math.rsqrt %14 : vector<64x1xf32>
    %16 = vector.broadcast %15 : vector<64x1xf32> to vector<64x128xf32>
    %17 = arith.mulf %7, %16 : vector<64x128xf32>
    %c0_7 = arith.constant 0 : index
    %c0_8 = arith.constant 0 : index
    %18 = vector.load %arg2[%c0_7, %c0_8] : memref<1x128xf32, #tpu.memory_space<vmem>>, vector<1x128xf32>
    %19 = vector.broadcast %18 : vector<1x128xf32> to vector<64x128xf32>
    %20 = arith.mulf %17, %19 : vector<64x128xf32>
    %c0_9 = arith.constant 0 : index
    %c0_10 = arith.constant 0 : index
    %21 = vector.load %arg3[%c0_9, %c0_10] : memref<1x128xf32, #tpu.memory_space<vmem>>, vector<1x128xf32>
    %22 = vector.broadcast %21 : vector<1x128xf32> to vector<64x128xf32>
    %23 = arith.addf %20, %22 : vector<64x128xf32>
    %c0_11 = arith.constant 0 : index
    %c0_12 = arith.constant 0 : index
    %24 = vector.load %arg5[%c0_11, %c0_12] : memref<64x128xf32, #tpu.memory_space<vmem>>, vector<64x128xf32>
    tpu.vector_store %arg5[%c0_11, %c0_12], %23 {strides = array<i32>} : memref<64x128xf32, #tpu.memory_space<vmem>>, vector<64x128xf32>,
    return
  }
  func.func @transform_0(%arg0: i32) -> (i32, i32) {
    %c0_i32 = arith.constant 0 : i32
    %c0_i32_0 = arith.constant 0 : i32
    return %arg0, %c0_i32 : i32, i32
  }
  func.func @transform_1(%arg0: i32) -> (i32, i32) {
    %c0_i32 = arith.constant 0 : i32
    %c0_i32_0 = arith.constant 0 : i32
    %c0_i32_1 = arith.constant 0 : i32
    return %c0_i32, %c0_i32_0 : i32, i32
  }
  func.func @transform_2(%arg0: i32) -> (i32, i32) {
    %c0_i32 = arith.constant 0 : i32
    %c0_i32_0 = arith.constant 0 : i32
    %c0_i32_1 = arith.constant 0 : i32
    return %c0_i32, %c0_i32_0 : i32, i32
  }
  func.func @transform_3(%arg0: i32) -> (i32, i32) {
    %c0_i32 = arith.constant 0 : i32
    %c0_i32_0 = arith.constant 0 : i32
    %c0_i32_1 = arith.constant 0 : i32
    return %c0_i32, %c0_i32_0 : i32, i32
  }
  func.func @transform_4(%arg0: i32) -> (i32, i32) {
    %c0_i32 = arith.constant 0 : i32
    %c0_i32_0 = arith.constant 0 : i32
    return %arg0, %c0_i32 : i32, i32
  }
}

</mosaic_0001>

<bundles_post_ra>
// kernel: tpu_custom_call.1
= control target key start
LH: loop header
LB: loop body
LE: loop exit
PB: predicated region body
PF: predicated region fallthrough
CT: control target
= control target key end

     0   :  { %9 = vsyncpa [#allocation3], 0  ;;  %s1663_s0 = inlined_call_operand.hbm [shape: f32[126,128], index: 0, kind: input, shape index: {}]   ;;  %s1664_s1 = inlined_call_operand.hbm [shape: f32[1,128], index: 1, kind: input, shape index: {}]   ;;  %s1665_s2 = inlined_call_operand.hbm [shape: f32[1,128], index: 2, kind: input, shape index: {}]   ;;  %s1666_s3 = inlined_call_operand.hbm [shape: f32[128,128], index: 3, kind: input, shape index: {}]   ;;  %s1667_s4 = inlined_call_operand.hbm [shape: f32[126,128], index: 4, kind: output, shape index: {}]  }
   0x1   :  { %11 = vsyncpa [#allocation3 + $0x1], 0 }
   0x2   :  { %12 = vsyncpa [#allocation6], 0 }
   0x3   :  { %13 = vsyncpa [#allocation9], 0 }
   0x4   :  { %14 = vsyncpa [#allocation4], 0 }
   0x5   :  { %16 = vsyncpa [#allocation4 + $0x1], 0  ;;  %s1331_s15 = smov 0   ;;  %s1333_s16 = smov 0  }
   0x6   :  { %s1335_s17 = smov 0   ;;  %s1337_s18 = smov 0  }
   0x7 LB: > { %s1352_s19 = sadd.s32 4294967295, %s1294_s18   ;;  %s782_s20 = sadd.s32 4294967294, %s1294_s18   ;;  %s1294_s18 = sphi %s1337_s18, %s1690_s18   ;;  %s1290_s17 = sphi %s1335_s17, %s1689_s17   ;;  %s1286_s16 = sphi %s1333_s16, %s1688_s16   ;;  %s1282_s15 = sphi %s1331_s15, %s1687_s15  }
   0x8   : > { %p42_p0 = scmp.ne.s32.totalorder %s1286_s16, %s1282_s15  ;;  %p1668_p1 = scmp.eq.s32.totalorder %s1352_s19, 0 }
   0x9   : > { %p135_p3 = scmp.eq.s32.totalorder %s782_s20, 1  ;;  %p783_p5 = scmp.ge.s32.totalorder %s1294_s18, 1 }
   0xa   : > { %p1361_p4 = por %p1668_p1, %p42_p0  ;;  %p142_p7 = scmp.lt.s32.totalorder %s1294_s18, 3 }
   0xb   : > { %p1366_p6 = por %p135_p3, %p42_p0  ;;  %s1296_s24 = smov [#allocation5]  }
   0xc   : > { %s1671_s21 = scalar_select %p1361_p4, 1, 0 }
   0xd   : > { %s1672_s22 = scalar_select %p1366_p6, 1, 0 }
   0xe   : > { %p1371_p8 = pnand %p783_p5, %p142_p7  ;;  %s155_s25 = sshll.u32 %s1296_s24, 4  ;;  %s156_s25 = int_to_ptr.vmem [resolvable:$true] %s155_s25 }
   0xf   : > { %s1297_s26 = smov [#allocation7]   ;;  %s1298_s29 = smov [#allocation8]  }
  0x10   : > { %s1673_s23 = scalar_select %p1371_p8, 1, 0 }
  0x11   : > { %p1022_p10 = pneg %p1371_p8  ;;  %s166_s27 = sshll.u32 %s1297_s26, 4  ;;  %s1384_s27 = int_to_ptr.vmem [resolvable:$true] %s166_s27 }
  0x12   : > { %s176_s30 = sshll.u32 %s1298_s29, 4  ;;  %s1106_s7 = scalar_lea.hbm %s1664_s1, 16  ;;  %s1386_s30 = int_to_ptr.vmem [resolvable:$true] %s176_s30 }
  0x13   : > { %p1380_p11 = pnand %p1022_p10, %p1668_p1  ;;  %p1107_p12 = scmp.ne.s32.totalorder %s1664_s1, %s1106_s7 }
  0x14   : > { %p1113_p5 = scmp.lt.u32.totalorder %s1106_s7, %s1664_s1 }
  0x15   : > { %p1396_p13 = pneg %p1380_p11 }
  0x17   : > { %p1109_p0 = pnand %p1396_p13, %p1107_p12 }
  0x19   : > { %p1110_p3 = pneg %p1109_p0 }
  0x1b   : > { %p1115_p7 = pnand %p1113_p5, %p1110_p3 }
  0x1d   : > { %1118 = shalt.err (!%p1115_p7)
}
  0x1e   : > { %s1119_s13 = scalar_lea.vmem %s156_s25, 16  ;;  %s1126_s14 = scalar_lea.vmem %s156_s25, 32 }
  0x1f   : > { %p1120_p10 = scmp.ne.s32.totalorder %s156_s25, %s1119_s13  ;;  %p1127_p2 = scmp.lt.s32.totalorder %s156_s25, %s156_s25 }
  0x20   : > { %p1128_p6 = scmp.lt.s32.totalorder %s1126_s14, %s1119_s13 }
  0x21   : > { %p1122_p9 = pnand %p1120_p10, %p1396_p13 }
  0x22   : > { %p1129_p4 = por %p1128_p6, %p1127_p2 }
  0x23   : > { %p1123_p1 = pneg %p1122_p9 }
  0x25   : > { %p1130_p8 = pnand %p1129_p4, %p1123_p1 }
  0x27   : > { %1133 = shalt.err (!%p1130_p8)
}
  0x28   : > { %1025 = dma.hbm_to_vmem [thread:$0]  (!%p1380_p11), %s1664_s1, 16, %s156_s25, [#allocation6]  }
  0x29   : > { %s1134_s5 = scalar_lea.hbm %s1665_s2, 16 }
  0x2a   : > { %p1135_p9 = scmp.ne.s32.totalorder %s1665_s2, %s1134_s5  ;;  %p1141_p1 = scmp.lt.u32.totalorder %s1134_s5, %s1665_s2 }
  0x2c   : > { %p1137_p12 = pnand %p1135_p9, %p1396_p13 }
  0x2e   : > { %p1138_p2 = pneg %p1137_p12 }
  0x30   : > { %p1143_p4 = pnand %p1141_p1, %p1138_p2 }
  0x32   : > { %1146 = shalt.err (!%p1143_p4)
}
  0x33   : > { %s1147_s25 = scalar_lea.vmem %s1384_s27, 16  ;;  %s1154_s11 = scalar_lea.vmem %s1384_s27, 32 }
  0x34   : > { %p1148_p6 = scmp.ne.s32.totalorder %s1384_s27, %s1147_s25  ;;  %p1155_p3 = scmp.lt.s32.totalorder %s1384_s27, %s1384_s27 }
  0x35   : > { %p1156_p5 = scmp.lt.s32.totalorder %s1154_s11, %s1147_s25 }
  0x36   : > { %p1150_p8 = pnand %p1148_p6, %p1396_p13 }
  0x37   : > { %p1157_p7 = por %p1156_p5, %p1155_p3 }
  0x38   : > { %p1151_p0 = pneg %p1150_p8 }
  0x3a   : > { %p1158_p10 = pnand %p1157_p7, %p1151_p0 }
  0x3c   : > { %1161 = shalt.err (!%p1158_p10)
}
  0x3d   : > { %1028 = dma.hbm_to_vmem [thread:$0]  (!%p1380_p11), %s1665_s2, 16, %s1384_s27, [#allocation6]  }
  0x3e   : > { %s1162_s24 = scalar_lea.hbm %s1666_s3, 2048 }
  0x3f   : > { %p1163_p9 = scmp.ne.s32.totalorder %s1666_s3, %s1162_s24  ;;  %p1169_p1 = scmp.lt.u32.totalorder %s1162_s24, %s1666_s3 }
  0x41   : > { %p1165_p12 = pnand %p1163_p9, %p1396_p13 }
  0x43   : > { %p1166_p2 = pneg %p1165_p12 }
  0x45   : > { %p1171_p4 = pnand %p1169_p1, %p1166_p2 }
  0x47   : > { %1174 = shalt.err (!%p1171_p4)
}
  0x48   : > { %s1175_s27 = scalar_lea.vmem %s1386_s30, 2048  ;;  %p1183_p3 = scmp.lt.s32.totalorder %s1386_s30, %s1386_s30 }
  0x49   : > { %p1176_p6 = scmp.ne.s32.totalorder %s1386_s30, %s1175_s27  ;;  %p1184_p5 = scmp.lt.s32.totalorder %s1175_s27, %s1175_s27 }
  0x4b   : > { %p1178_p8 = pnand %p1176_p6, %p1396_p13  ;;  %p1185_p7 = por %p1184_p5, %p1183_p3 }
  0x4d   : > { %p1179_p0 = pneg %p1178_p8 }
  0x4f   : > { %p1186_p10 = pnand %p1185_p7, %p1179_p0 }
  0x51   : > { %1189 = shalt.err (!%p1186_p10)
}
  0x52   : > { %s1299_s7 = smov 128   ;;  %s1300_s10 = smov 8  }
  0x53   : > { %1031 = dma.hbm_to_vmem [thread:$0]  (!%p1380_p11), %s1666_s3, 2048, %s1386_s30, [#allocation9], %s1299_s7, %s1299_s7, %s1300_s10  }
  0x54   : > { %s1463_s25 = sadd.s32 1, %s1294_s18   ;;  %s29_s12 = sadd.s32 1, %s1290_s17 }
  0x55   : > { %s26_s11 = ssub.s32 %s1294_s18, %s1463_s25  ;;  %p36_p9 = scmp.ne.s32.totalorder %s1290_s17, %s1286_s16 }
  0x56   : > { %p27_p13 = scmp.eq.s32.totalorder %s26_s11, 0  ;;  %p37_p12 = scmp.eq.s32.totalorder %s1294_s18, 0 }
  0x57   : > { %p1043_p2 = scmp.lt.s32.totalorder %s1294_s18, 2  ;;  %p1676_p4 = scmp.eq.s32.totalorder %s1352_s19, 1 }
  0x58   : > { %s1473_s13 = scalar_select %p27_p13, %s1290_s17, %s29_s12  }
  0x59   : > { %p38_p1 = por %p37_p12, %p36_p9  ;;  %p1477_p6 = por %p1676_p4, %p36_p9 }
  0x5a   : > { %s190_s14 = sand.u32 1, %s1290_s17   ;;  %s804_s20 = sshll.u32 %s1294_s18, 10 }
  0x5b   : > { %s788_s30 = sshll.u32 %s190_s14, 6  ;;  %s1486_s29 = scalar_lea.hbm %s1663_s0, %s804_s20 }
  0x5c   : > { %s194_s5 = scalar_lea.vmem [#allocation2], %s788_s30  ;;  %p1488_p11 = pnand %p1043_p2, %p38_p1 }
  0x5d   : > { %s201_s6 = sshll.u32 %s194_s5, 4  ;;  %s1494_s8 = scalar_lea.sflag [#allocation3], %s190_s14  ;;  %s1492_s6 = int_to_ptr.vmem [resolvable:$true] %s201_s6 }
  0x5e   : > { %s1190_s9 = scalar_lea.hbm %s1486_s29, 1024  ;;  %p1192_p0 = pneg %p1488_p11 }
  0x5f   : > { %p1191_p8 = scmp.ne.s32.totalorder %s1486_s29, %s1190_s9  ;;  %s1195_s20 = scalar_lea.hbm %s1663_s0, 2048 }
  0x60   : > { %p1196_p7 = scmp.lt.u32.totalorder %s1486_s29, %s1663_s0  ;;  %p1197_p10 = scmp.lt.u32.totalorder %s1195_s20, %s1190_s9 }
  0x61   : > { %p1193_p3 = pnand %p1192_p0, %p1191_p8  ;;  %p1199_p9 = scmp.lt.u32.totalorder %s1190_s9, %s1486_s29 }
  0x62   : > { %p1198_p13 = por %p1197_p10, %p1196_p7 }
  0x63   : > { %p1194_p5 = pneg %p1193_p3 }
  0x64   : > { %p1200_p12 = por %p1199_p9, %p1198_p13 }
  0x66   : > { %p1201_p2 = pnand %p1200_p12, %p1194_p5 }
  0x68   : > { %1204 = shalt.err (!%p1201_p2)
}
  0x69   : > { %s1205_s14 = scalar_lea.vmem %s1492_s6, 1024  ;;  %s1301_s26 = smov [#allocation2]  }
  0x6a   : > { %p1206_p1 = scmp.ne.s32.totalorder %s1492_s6, %s1205_s14  ;;  %s1210_s5 = sshll.u32 %s1301_s26, 4  ;;  %s1211_s5 = int_to_ptr.vmem [resolvable:$false] %s1210_s5 }
  0x6b   : > { %s1212_s11 = scalar_lea.vmem %s1211_s5, 2048  ;;  %p1213_p3 = scmp.lt.s32.totalorder %s1492_s6, %s1211_s5 }
  0x6c   : > { %p1208_p4 = pnand %p1206_p1, %p1192_p0  ;;  %p1214_p7 = scmp.lt.s32.totalorder %s1212_s11, %s1205_s14 }
  0x6e   : > { %p1209_p8 = pneg %p1208_p4  ;;  %p1215_p10 = por %p1214_p7, %p1213_p3 }
  0x70   : > { %p1216_p13 = pnand %p1215_p10, %p1209_p8 }
  0x72   : > { %1219 = shalt.err (!%p1216_p13)
}
  0x73   : > { %1035 = dma.hbm_to_vmem [thread:$0]  (!%p1488_p11), %s1486_s29, 1024, %s1492_s6, %s1494_s8, %s1299_s7, %s1299_s7, %s1300_s10  }
  0x74   : > { %p1679_p0 = scmp.ne.s32.totalorder %s1673_s23, 0 }
  0x75   : > { %s1528_s9 = sand.u32 (!%p1679_p0), 1, %s1286_s16   ;;  %p1680_p5 = scmp.ne.s32.totalorder (!%p1679_p0), %s1671_s21, 0 }
  0x76   : > { %213 = sbr.rel (%p1679_p0) target bundleno = 908 (0x38c), region = 36  ;;  %s792_s12 = sshll.u32 (!%p1679_p0), %s1528_s9, 6 }
  0x77   : > { %s216_s20 = scalar_lea.sflag (!%p1679_p0), [#allocation3], %s1528_s9  ;;  %s1534_s27 = scalar_lea.vmem (!%p1679_p0), [#allocation2], %s792_s12 }
  0x7d   : > { %1265 = dma.done.wait (%p1680_p5), %s216_s20, 1024  }
  0x7e   : > { %1267 = vsyncadd (%p1680_p5), %s216_s20, 4294966272  ;;  %p1681_p11 = scmp.eq.s32.totalorder %s1352_s19, 0 }
  0x80   : > { %1269 = dma.done.wait (%p1681_p11), [#allocation6], 32   ;;  %p1682_p9 = pmov %p1681_p11 }
  0x82   : > { %1271 = vsyncadd (%p1682_p9), [#allocation6], 4294967264  ;;  %p1683_p12 = pmov %p1682_p9 }
  0x83   : > { %p1684_p2 = pmov %p1682_p9 }
  0x84   : > { %1273 = dma.done.wait (%p1683_p12), [#allocation9], 2048  }
  0x85   : > { %1275 = vsyncadd (%p1684_p2), [#allocation9], 4294965248  ;;  %v266_v0 = vld [vmem:[#allocation8] sm:$0xff]  ;;  %v267_v1 = vld [vmem:[#allocation8 + $0x8] sm:$0xff]  ;;  %v1302_v32 = vmov 0   ;;  %s1598_s21 = scalar_lea.vmem [#allocation10], %s792_s12 }
  0x86   : > { %v268_v2 = vld [vmem:[#allocation8 + $0x10] sm:$0xff]  ;;  %v942_v3 = vpack.c.bf16 %v267_v1, %v266_v0  ;;  %v269_v4 = vld [vmem:[#allocation8 + $0x18] sm:$0xff]  ;;  %v270_v6 = vld [vmem:[#allocation8 + $0x20] sm:$0xff]  ;;  %1088 = vset.pattern.permute.xlu0 %v1302_v32  ;;  %1089 = vset.pattern.permute.xlu1 %v1302_v32  ;;  %s805_s23 = sshll.u32 %s1352_s19, 10  ;;  %s680_s7 = sshll.u32 %s1598_s21, 4  ;;  %s1617_s7 = int_to_ptr.vmem [resolvable:$true] %s680_s7 }
  0x87   : > { %v946_v5 = vpack.c.bf16 %v269_v4, %v268_v2  ;;  %v271_v7 = vld [vmem:[#allocation8 + $0x28] sm:$0xff]  ;;  %v1549_v9 = vld [vmem:[%s1534_s27] sm:$0xff]  ;;  %v272_v10 = vld [vmem:[#allocation8 + $0x30] sm:$0xff]  ;;  %s1615_s6 = scalar_lea.hbm %s1667_s4, %s805_s23  ;;  %s667_s19 = scalar_lea.sflag [#allocation4], %s1528_s9 }
  0x88   : > { %943 = vmatprep.subr.bf16.mxu0 %v942_v3  ;;  %975 = vmatprep.subr.bf16.mxu1 %v942_v3  ;;  %v950_v8 = vpack.c.bf16 %v271_v7, %v270_v6  ;;  %v273_v11 = vld [vmem:[#allocation8 + $0x38] sm:$0xff]  ;;  %v274_v13 = vld [vmem:[#allocation8 + $0x40] sm:$0xff]  ;;  %v275_v14 = vld [vmem:[#allocation8 + $0x48] sm:$0xff]  ;;  %s1220_s8 = scalar_lea.vmem %s1617_s7, 1024  ;;  %s1303_s30 = smov [#allocation10]  }
  0x89   : > { %945 = vmatpush3.bf16.msra.mxu0 %v942_v3  ;;  %977 = vmatpush3.bf16.msra.mxu1 %v942_v3  ;;  %v954_v12 = vpack.c.bf16 %v273_v11, %v272_v10  ;;  %v958_v15 = vpack.c.bf16 %v275_v14, %v274_v13  ;;  %v276_v16 = vld [vmem:[#allocation8 + $0x50] sm:$0xff]  ;;  %v277_v17 = vld [vmem:[#allocation8 + $0x58] sm:$0xff]  ;;  %v278_v19 = vld [vmem:[#allocation8 + $0x60] sm:$0xff]  ;;  %p1221_p1 = scmp.ne.s32.totalorder %s1617_s7, %s1220_s8  ;;  %s1224_s24 = sshll.u32 %s1303_s30, 4  ;;  %s1225_s24 = int_to_ptr.vmem [resolvable:$false] %s1224_s24 }
  0x8a   : > { %947 = vmatprep.subr.bf16.mxu0 %v946_v5  ;;  %979 = vmatprep.subr.bf16.mxu1 %v946_v5  ;;  %v962_v18 = vpack.c.bf16 %v277_v17, %v276_v16  ;;  %v279_v20 = vld [vmem:[#allocation8 + $0x68] sm:$0xff]  ;;  %v280_v22 = vld [vmem:[#allocation8 + $0x70] sm:$0xff]  ;;  %v281_v23 = vld [vmem:[#allocation8 + $0x78] sm:$0xff]  ;;  %s1226_s14 = scalar_lea.vmem %s1225_s24, 2048  ;;  %p1227_p3 = scmp.lt.s32.totalorder %s1617_s7, %s1225_s24 }
  0x8b   : > { %886 = vmatprep.mubr.f32.mxu0 %v1549_v9  ;;  %v966_v21 = vpack.c.bf16 %v279_v20, %v278_v19  ;;  %v970_v24 = vpack.c.bf16 %v281_v23, %v280_v22  ;;  %v259_v25 = vld [vmem:[%s1534_s27 + $0x8] sm:$0xff]  ;;  %v260_v26 = vld [vmem:[%s1534_s27 + $0x10] sm:$0xff]  ;;  %v261_v27 = vld [vmem:[%s1534_s27 + $0x18] sm:$0xff]  ;;  %p1222_p4 = pnand %p1221_p1, %p1477_p6  ;;  %p1228_p7 = scmp.lt.s32.totalorder %s1226_s14, %s1220_s8 }
  0x8c   : > { %v262_v28 = vld [vmem:[%s1534_s27 + $0x20] sm:$0xff]  ;;  %v263_v29 = vld [vmem:[%s1534_s27 + $0x28] sm:$0xff]  ;;  %v264_v30 = vld [vmem:[%s1534_s27 + $0x30] sm:$0xff] }
  0x8d   : > { %949 = vmatpush3.bf16.msra.mxu0 %v946_v5  ;;  %981 = vmatpush3.bf16.msra.mxu1 %v946_v5  ;;  %v265_v31 = vld [vmem:[%s1534_s27 + $0x38] sm:$0xff]  ;;  %p1223_p8 = pneg %p1222_p4  ;;  %p1229_p10 = por %p1228_p7, %p1227_p3 }
  0x8e   : > { %951 = vmatprep.subr.bf16.mxu0 %v950_v8  ;;  %983 = vmatprep.subr.bf16.mxu1 %v950_v8 }
  0x8f   : > { %p1230_p13 = pnand %p1229_p10, %p1223_p8 }
  0x91   : > { %953 = vmatpush3.bf16.msra.mxu0 %v950_v8  ;;  %985 = vmatpush3.bf16.msra.mxu1 %v950_v8 }
  0x92   : > { %955 = vmatprep.subr.bf16.mxu0 %v954_v12  ;;  %987 = vmatprep.subr.bf16.mxu1 %v954_v12 }
  0x95   : > { %957 = vmatpush3.bf16.msra.mxu0 %v954_v12  ;;  %989 = vmatpush3.bf16.msra.mxu1 %v954_v12 }
  0x96   : > { %959 = vmatprep.subr.bf16.mxu0 %v958_v15  ;;  %991 = vmatprep.subr.bf16.mxu1 %v958_v15 }
  0x99   : > { %961 = vmatpush3.bf16.msra.mxu0 %v958_v15  ;;  %993 = vmatpush3.bf16.msra.mxu1 %v958_v15 }
  0x9a   : > { %963 = vmatprep.subr.bf16.mxu0 %v962_v18  ;;  %995 = vmatprep.subr.bf16.mxu1 %v962_v18 }
  0x9d   : > { %965 = vmatpush3.bf16.msra.mxu0 %v962_v18  ;;  %997 = vmatpush3.bf16.msra.mxu1 %v962_v18 }
  0x9e   : > { %967 = vmatprep.subr.bf16.mxu0 %v966_v21  ;;  %999 = vmatprep.subr.bf16.mxu1 %v966_v21 }
  0xa1   : > { %969 = vmatpush3.bf16.msra.mxu0 %v966_v21  ;;  %1001 = vmatpush3.bf16.msra.mxu1 %v966_v21 }
  0xa2   : > { %971 = vmatprep.subr.bf16.mxu0 %v970_v24  ;;  %1003 = vmatprep.subr.bf16.mxu1 %v970_v24 }
  0xa5   : > { %973 = vmatpush3.bf16.msra.mxu0 %v970_v24  ;;  %1005 = vmatpush3.bf16.msra.mxu1 %v970_v24 }
  0xa8   : > { %887 = vmatmul.mubr.f32.vlgmr.msra.gmra.mrb[0].mxu0 %v259_v25 }
  0xa9   : > { %889 = vmatprep.mubr.f32.mxu0 %v260_v26 }
  0xac   : > { %890 = vmatmul.mubr.f32.gmra.mrb[2].mxu0 %v261_v27 }
  0xad   : > { %892 = vmatprep.mubr.f32.mxu0 %v262_v28 }
  0xb0   : > { %893 = vmatmul.mubr.f32.gmra.mrb[4].mxu0 %v263_v29 }
  0xb1   : > { %895 = vmatprep.mubr.f32.mxu0 %v264_v30 }
  0xb4   : > { %896 = vmatmul.mubr.f32.gmra.mrb[6].mxu0 %v265_v31 }
 0x17b   : > { %v888_v33 = vpop.f32.mrb[0].mxu0 }
 0x17c   : > { %v348_v34 = vpop.f32.mrb[1].mxu0  ;;  %v388_v38 = vmul.f32 0.0078125, %v888_v33 }
 0x17d   : > { %v387_v35 = vmul.f32 0.0078125, %v348_v34 }
 0x17f   : > { %397 = vperm.xlu0 %1088, %v387_v35   ;;  %v891_v36 = vpop.f32.mrb[2].mxu0 }
 0x180   : > { %v358_v37 = vpop.f32.mrb[3].mxu0  ;;  %v390_v42 = vmul.f32 0.0078125, %v891_v36 }
 0x181   : > { %v389_v39 = vmul.f32 0.0078125, %v358_v37 }
 0x183   : > { %402 = vperm.xlu0 %1088, %v388_v38   ;;  %407 = vperm.xlu1 %1089, %v389_v39   ;;  %v894_v40 = vpop.f32.mrb[4].mxu0 }
 0x184   : > { %v368_v41 = vpop.f32.mrb[5].mxu0  ;;  %v392_v46 = vmul.f32 0.0078125, %v894_v40 }
 0x185   : > { %v391_v43 = vmul.f32 0.0078125, %v368_v41  ;;  %v797_v41 = vld [vmem:[#allocation5] ss:$0 sm:$0xff] }
 0x187   : > { %412 = vperm.xlu1 %1089, %v390_v42   ;;  %417 = vperm.xlu0 %1088, %v391_v43   ;;  %v897_v44 = vpop.f32.mrb[6].mxu0 }
 0x188   : > { %v378_v45 = vpop.f32.mrb[7].mxu0  ;;  %v394_v48 = vmul.f32 0.0078125, %v897_v44 }
 0x189   : > { %v393_v47 = vmul.f32 0.0078125, %v378_v45  ;;  %v798_v45 = vld [vmem:[#allocation7] ss:$0 sm:$0xff] }
 0x18b   : > { %422 = vperm.xlu1 %1089, %v392_v46   ;;  %427 = vperm.xlu0 %1088, %v393_v47  }
 0x18f   : > { %432 = vperm.xlu1 %1089, %v394_v48  }
 0x1fe   : > { %v398_v49 = vpop.permute.xlu0 %397 }
 0x1ff   : > { %v1560_v50 = vsub.f32 %v1549_v9, %v398_v49 }
 0x201   : > { %v443_v51 = vmul.f32 %v1560_v50, %v1560_v50 }
 0x202   : > { %v403_v52 = vpop.permute.xlu0 %402  ;;  %v408_v53 = vpop.permute.xlu1 %407 }
 0x203   : > { %v1564_v54 = vsub.f32 %v259_v25, %v403_v52  ;;  %v1566_v55 = vsub.f32 %v260_v26, %v408_v53  ;;  %930 = vmatprep.mubr.f32.mxu1 %v443_v51 }
 0x205   : > { %v444_v56 = vmul.f32 %v1564_v54, %v1564_v54  ;;  %v445_v57 = vmul.f32 %v1566_v55, %v1566_v55 }
 0x206   : > { %v413_v58 = vpop.permute.xlu1 %412  ;;  %v418_v59 = vpop.permute.xlu0 %417 }
 0x207   : > { %v1572_v60 = vsub.f32 %v261_v27, %v413_v58  ;;  %v1574_v61 = vsub.f32 %v262_v28, %v418_v59  ;;  %931 = vmatmul.mubr.f32.vlgmr.msra.gmra.mrb[0].mxu1 %v444_v56 }
 0x208   : > { %933 = vmatprep.mubr.f32.mxu1 %v445_v57 }
 0x209   : > { %v446_v62 = vmul.f32 %v1572_v60, %v1572_v60  ;;  %v447_v63 = vmul.f32 %v1574_v61, %v1574_v61 }
 0x20a   : > { %v423_v0 = vpop.permute.xlu1 %422  ;;  %v428_v1 = vpop.permute.xlu0 %427 }
 0x20b   : > { %v1580_v2 = vsub.f32 %v263_v29, %v423_v0  ;;  %v1582_v3 = vsub.f32 %v264_v30, %v428_v1  ;;  %934 = vmatmul.mubr.f32.gmra.mrb[2].mxu1 %v446_v62 }
 0x20c   : > { %936 = vmatprep.mubr.f32.mxu1 %v447_v63 }
 0x20d   : > { %v448_v4 = vmul.f32 %v1580_v2, %v1580_v2  ;;  %v449_v5 = vmul.f32 %v1582_v3, %v1582_v3 }
 0x20e   : > { %v433_v6 = vpop.permute.xlu1 %432 }
 0x20f   : > { %v1588_v7 = vsub.f32 %v265_v31, %v433_v6  ;;  %937 = vmatmul.mubr.f32.gmra.mrb[4].mxu1 %v448_v4 }
 0x210   : > { %939 = vmatprep.mubr.f32.mxu1 %v449_v5 }
 0x211   : > { %v450_v8 = vmul.f32 %v1588_v7, %v1588_v7 }
 0x213   : > { %940 = vmatmul.mubr.f32.gmra.mrb[6].mxu1 %v450_v8 }
 0x2da   : > { %v932_v9 = vpop.f32.mrb[0].mxu1 }
 0x2db   : > { %v557_v10 = vmul.f32 0.0078125, %v932_v9  ;;  %v517_v11 = vpop.f32.mrb[1].mxu1 }
 0x2dc   : > { %v556_v12 = vmul.f32 0.0078125, %v517_v11 }
 0x2dd   : > { %v565_v13 = vadd.f32 1e-06, %v557_v10 }
 0x2de   : > { %v564_v14 = vadd.f32 1e-06, %v556_v12  ;;  %v935_v15 = vpop.f32.mrb[2].mxu1 }
 0x2df   : > { %1090 = vrsqrt.f32 %v565_v13  ;;  %v559_v16 = vmul.f32 0.0078125, %v935_v15  ;;  %v527_v17 = vpop.f32.mrb[3].mxu1 }
 0x2e0   : > { %1092 = vrsqrt.f32 %v564_v14  ;;  %v558_v18 = vmul.f32 0.0078125, %v527_v17 }
 0x2e1   : > { %v567_v19 = vadd.f32 1e-06, %v559_v16 }
 0x2e2   : > { %v566_v20 = vadd.f32 1e-06, %v558_v18  ;;  %v938_v21 = vpop.f32.mrb[4].mxu1 }
 0x2e3   : > { %1094 = vrsqrt.f32 %v567_v19  ;;  %v561_v22 = vmul.f32 0.0078125, %v938_v21  ;;  %v537_v23 = vpop.f32.mrb[5].mxu1 }
 0x2e4   : > { %1096 = vrsqrt.f32 %v566_v20  ;;  %v560_v24 = vmul.f32 0.0078125, %v537_v23 }
 0x2e5   : > { %v569_v25 = vadd.f32 1e-06, %v561_v22 }
 0x2e6   : > { %v568_v26 = vadd.f32 1e-06, %v560_v24  ;;  %v941_v27 = vpop.f32.mrb[6].mxu1 }
 0x2e7   : > { %1098 = vrsqrt.f32 %v569_v25  ;;  %v563_v28 = vmul.f32 0.0078125, %v941_v27  ;;  %v547_v29 = vpop.f32.mrb[7].mxu1 }
 0x2e8   : > { %1100 = vrsqrt.f32 %v568_v26  ;;  %v562_v30 = vmul.f32 0.0078125, %v547_v29 }
 0x2e9   : > { %v1091_v31 = vpop.eup %1090  ;;  %v571_v32 = vadd.f32 1e-06, %v563_v28 }
 0x2ea   : > { %v1093_v33 = vpop.eup %1092  ;;  %v570_v34 = vadd.f32 1e-06, %v562_v30  ;;  %587 = vperm.xlu1 %1089, %v1091_v31  }
 0x2eb   : > { %1102 = vrsqrt.f32 %v571_v32  ;;  %582 = vperm.xlu0 %1088, %v1093_v33  }
 0x2ec   : > { %1104 = vrsqrt.f32 %v570_v34 }
 0x2ed   : > { %v1095_v35 = vpop.eup %1094 }
 0x2ee   : > { %v1097_v36 = vpop.eup %1096  ;;  %597 = vperm.xlu1 %1089, %v1095_v35  }
 0x2ef   : > { %592 = vperm.xlu0 %1088, %v1097_v36  }
 0x2f1   : > { %v1099_v37 = vpop.eup %1098 }
 0x2f2   : > { %v1101_v38 = vpop.eup %1100  ;;  %607 = vperm.xlu1 %1089, %v1099_v37  }
 0x2f3   : > { %602 = vperm.xlu0 %1088, %v1101_v38  }
 0x2f5   : > { %v1103_v39 = vpop.eup %1102 }
 0x2f6   : > { %v1105_v40 = vpop.eup %1104  ;;  %617 = vperm.xlu1 %1089, %v1103_v39  }
 0x2f7   : > { %612 = vperm.xlu0 %1088, %v1105_v40  }
 0x369   : > { %v588_v42 = vpop.permute.xlu1 %587 }
 0x36a   : > { %v621_v43 = vmul.f32 %v588_v42, %v1564_v54  ;;  %v583_v44 = vpop.permute.xlu0 %582 }
 0x36b   : > { %v620_v46 = vmul.f32 %v583_v44, %v1560_v50 }
 0x36c   : > { %v636_v47 = vmul.f32 %v797_v41, %v621_v43 }
 0x36d   : > { %v635_v48 = vmul.f32 %v797_v41, %v620_v46  ;;  %v598_v49 = vpop.permute.xlu1 %597 }
 0x36e   : > { %v651_v51 = vadd.f32 %v798_v45, %v636_v47  ;;  %v623_v52 = vmul.f32 %v598_v49, %v1572_v60  ;;  %v593_v53 = vpop.permute.xlu0 %592 }
 0x36f   : > { %v650_v56 = vadd.f32 %v798_v45, %v635_v48  ;;  %v622_v57 = vmul.f32 %v593_v53, %v1566_v55 }
 0x370   : > { %659 = vst [vmem:[%s1598_s21 + $0x8] sm:$0xff] %v651_v51  ;;  %v638_v54 = vmul.f32 %v797_v41, %v623_v52 }
 0x371   : > { %658 = vst [vmem:[%s1598_s21] sm:$0xff] %v650_v56  ;;  %v637_v50 = vmul.f32 %v797_v41, %v622_v57  ;;  %v608_v58 = vpop.permute.xlu1 %607 }
 0x372   : > { %v653_v59 = vadd.f32 %v798_v45, %v638_v54  ;;  %v625_v60 = vmul.f32 %v608_v58, %v1580_v2  ;;  %v603_v62 = vpop.permute.xlu0 %602 }
 0x373   : > { %v652_v55 = vadd.f32 %v798_v45, %v637_v50  ;;  %v624_v63 = vmul.f32 %v603_v62, %v1574_v61 }
 0x374   : > { %661 = vst [vmem:[%s1598_s21 + $0x18] sm:$0xff] %v653_v59  ;;  %v640_v0 = vmul.f32 %v797_v41, %v625_v60 }
 0x375   : > { %660 = vst [vmem:[%s1598_s21 + $0x10] sm:$0xff] %v652_v55  ;;  %v639_v1 = vmul.f32 %v797_v41, %v624_v63  ;;  %v618_v4 = vpop.permute.xlu1 %617 }
 0x376   : > { %v655_v5 = vadd.f32 %v798_v45, %v640_v0  ;;  %v627_v6 = vmul.f32 %v618_v4, %v1588_v7  ;;  %v613_v8 = vpop.permute.xlu0 %612 }
 0x377   : > { %v654_v9 = vadd.f32 %v798_v45, %v639_v1  ;;  %v626_v2 = vmul.f32 %v613_v8, %v1582_v3 }
 0x378   : > { %663 = vst [vmem:[%s1598_s21 + $0x28] sm:$0xff] %v655_v5  ;;  %v642_v61 = vmul.f32 %v797_v41, %v627_v6 }
 0x379   : > { %662 = vst [vmem:[%s1598_s21 + $0x20] sm:$0xff] %v654_v9  ;;  %v641_v10 = vmul.f32 %v797_v41, %v626_v2 }
 0x37a   : > { %v657_v11 = vadd.f32 %v798_v45, %v642_v61 }
 0x37b   : > { %v656_v7 = vadd.f32 %v798_v45, %v641_v10 }
 0x37c   : > { %665 = vst [vmem:[%s1598_s21 + $0x38] sm:$0xff] %v657_v11 }
 0x37d   : > { %664 = vst [vmem:[%s1598_s21 + $0x30] sm:$0xff] %v656_v7 }
 0x37e   : > { %1233 = shalt.err (!%p1230_p13)
}
 0x37f   : > { %s1234_s26 = scalar_lea.hbm %s1615_s6, 1024  ;;  %s1238_s12 = scalar_lea.hbm %s1667_s4, 2048 }
 0x380   : > { %p1235_p0 = scmp.ne.s32.totalorder %s1615_s6, %s1234_s26  ;;  %p1239_p9 = scmp.lt.u32.totalorder %s1615_s6, %s1667_s4 }
 0x381   : > { %p1240_p12 = scmp.lt.u32.totalorder %s1238_s12, %s1234_s26  ;;  %p1242_p1 = scmp.lt.u32.totalorder %s1234_s26, %s1615_s6 }
 0x382   : > { %p1236_p5 = pnand %p1235_p0, %p1477_p6 }
 0x383   : > { %p1241_p2 = por %p1240_p12, %p1239_p9 }
 0x384   : > { %p1237_p11 = pneg %p1236_p5 }
 0x385   : > { %p1243_p4 = por %p1242_p1, %p1241_p2 }
 0x387   : > { %p1244_p8 = pnand %p1243_p4, %p1237_p11 }
 0x389   : > { %1247 = shalt.err (!%p1244_p8)
}
 0x38a   : > { %s1304_s21 = smov 128   ;;  %s1305_s23 = smov 8  }
 0x38b   : > { %1020 = dma.vmem_to_hbm [thread:$0]  (%p1477_p6), %s1617_s7, 1024, %s1615_s6, %s667_s19, %s1304_s21, %s1304_s21, %s1305_s23  }
 0x38c PF: > { %s695_s10 = sand.u32 1, %s1282_s15   ;;  %p1685_p3 = scmp.ne.s32.totalorder %s1672_s22, 0 }
 0x38d   : > { %p1686_p7 = scmp.ge.s32.totalorder %s1294_s18, 2  ;;  %s696_s29 = scalar_lea.sflag [#allocation4], %s695_s10 }
 0x38f   : > { %p1037_p10 = pnand %p1686_p7, %p1685_p3 }
 0x391   : > { %1277 = dma.done.wait (!%p1037_p10), %s696_s29, 1024  }
 0x392   : > { %1279 = vsyncadd (!%p1037_p10), %s696_s29, 4294966272  ;;  %p19_p13 = scmp.ge.s32.totalorder %s1463_s25, 4   ;;  %s1687_s15 = smov %s1286_s16 }
 0x393   : > { %s1688_s16 = smov %s1290_s17  ;;  %s1689_s17 = smov %s1473_s13 }
 0x394   : > { %s1690_s18 = smov %s1463_s25  ;;  %21 = sbr.rel (!%p19_p13) target bundleno = 7 (0x7), region = 93 }
 0x39b   :  { %701 = vsyncpa [#allocation3], 1 }
 0x39c   :  { %703 = vsyncpa [#allocation3 + $0x1], 1 }
 0x39d   :  { %704 = vsyncpa [#allocation6], 1 }
 0x39e   :  { %705 = vsyncpa [#allocation9], 1 }
 0x39f   :  { %706 = vsyncpa [#allocation4], 1 }
 0x3a0   :  { %708 = vsyncpa [#allocation4 + $0x1], 1 }

</bundles_post_ra>
